<compile_context>
chip_gen: v7x
topology: tpu7x:2x2x1
jax: 0.10.0
libtpu: 0.0.40
codegen_flags: <defaults>
</compile_context>

<pallas_src>
import jax
import jax.numpy as jnp
from jax.experimental import pallas as pl
from jax.experimental.pallas import tpu as pltpu

LN_EPS = 1e-5          # PyTorch nn.LayerNorm default
_MAX_TILE_ROWS = 512   # target 256-512 rows per grid step


def _round_up(x, m):
    return ((x + m - 1) // m) * m


def _ln_unit(h_f32):
    """Affine-free LayerNorm in f32 (two-pass variance: no cancellation)."""
    m = jnp.mean(h_f32, axis=-1, keepdims=True)
    v = jnp.mean(jnp.square(h_f32 - m), axis=-1, keepdims=True)
    return (h_f32 - m) * jax.lax.rsqrt(v + LN_EPS)


def _lin(h_bf16, w_ref, b_ref):
    """bf16 x bf16 MXU matmul, f32 accumulation, f32 bias add."""
    return jnp.dot(h_bf16, w_ref[...],
                   preferred_element_type=jnp.float32) + b_ref[...]


def _relu_bf16(h_f32):
    """ReLU on the f32 accumulator, single cast to bf16 for the next dot."""
    return jnp.maximum(h_f32, 0.0).astype(jnp.bfloat16)


def _make_kernel(num_iter):
    def kernel(*refs):
        x_ref = refs[0]
        wp_ref, bp_ref = refs[1], refs[2]
        iter_refs = refs[3:3 + 6 * num_iter]
        wo_ref, bo_ref, out_ref = refs[3 + 6 * num_iter:]

        # Input LayerNorm (affine folded into proj_in) + projection + ReLU.
        h = _ln_unit(x_ref[...]).astype(jnp.bfloat16)
        h = _relu_bf16(_lin(h, wp_ref, bp_ref))

        # DictIteration blocks (statically unrolled; num_iter is small).
        for i in range(num_iter):
            w1, b1, w2, b2, w3, b3 = iter_refs[6 * i:6 * (i + 1)]
            h = _relu_bf16(_lin(h, w1, b1))
            h2 = jnp.maximum(_lin(h, w2, b2), 0.0)        # f32 for LN stats
            # LN affine folded into (w3, b3); output cast once for next dot.
            h = _lin(_ln_unit(h2).astype(jnp.bfloat16), w3, b3).astype(jnp.bfloat16)

        # Output projection directly into a lane-dense (128-padded) slab.
        out_ref[...] = _lin(h, wo_ref, bo_ref).astype(out_ref.dtype)

    return kernel


def prepare_params(params):
    """One-time prep: fold LN affines into adjacent Linears, cast weights to
    bf16, pad the output projection to a 128-lane multiple."""
    g_in, b_in = params['ln_in']
    wp, bp = params['proj_in']
    wo, bo = params['proj_out']
    f_mid, f_out = wo.shape
    f_out_pad = _round_up(f_out, 128)

    # Fold ln_in affine: (LN(x)*g + b) @ Wp + bp == LN(x) @ (diag(g)Wp) + (b@Wp + bp)
    wp_f = g_in.reshape(-1, 1) * wp
    bp_f = b_in.reshape(1, -1) @ wp + bp

    wo_p = jnp.zeros((f_mid, f_out_pad), jnp.float32).at[:, :f_out].set(wo)
    bo_p = jnp.zeros((1, f_out_pad), jnp.float32).at[:, :f_out].set(bo)

    ops = [wp_f.astype(jnp.bfloat16), bp_f.astype(jnp.float32)]
    for (w1, b1, w2, b2, g, be, w3, b3) in params['iters']:
        w3_f = g.reshape(-1, 1) * w3
        b3_f = be.reshape(1, -1) @ w3 + b3
        ops += [w1.astype(jnp.bfloat16), b1.astype(jnp.float32),
                w2.astype(jnp.bfloat16), b2.astype(jnp.float32),
                w3_f.astype(jnp.bfloat16), b3_f.astype(jnp.float32)]
    ops += [wo_p.astype(jnp.bfloat16), bo_p]

    return {
        'ops': tuple(ops),
        'num_iter': len(params['iters']),
        'f_mid': int(f_mid),
        'f_out': int(f_out),
        'f_out_pad': int(f_out_pad),
    }


def dict_stack_forward(batch, prepared):
    a, b = batch['a'], batch['b']
    n_a = a.shape[0]
    x = jnp.concatenate([a, b], axis=0)      # both dict entries -> one launch
    rows, f_in = x.shape

    ops = prepared['ops']
    num_iter = prepared['num_iter']
    f_mid = prepared['f_mid']
    f_out = prepared['f_out']
    f_out_pad = prepared['f_out_pad']

    # Hardware-sized row tiling: multiple of 16 (bf16 sublanes), <= 512 rows
    # per step.  Small batches => a single grid step (no sequential loop on
    # single-TC chips); large batches => each step is a real MXU-sized chunk.
    tile_rows = min(_round_up(rows, 16), _MAX_TILE_ROWS)
    rows_pad = _round_up(rows, tile_rows)
    num_tiles = rows_pad // tile_rows
    if rows_pad != rows:
        x = jnp.zeros((rows_pad, f_in), x.dtype).at[:rows].set(x)

    in_specs = [pl.BlockSpec((tile_rows, f_in), lambda r: (r, 0))]
    # Constants: whole-array, VMEM-resident, single-buffered (no per-step DMA,
    # no wasted double buffer).
    in_specs += [pl.BlockSpec(memory_space=pltpu.MemorySpace.VMEM) for _ in ops]
    out_spec = pl.BlockSpec((tile_rows, f_out_pad), lambda r: (r, 0))

    # --- VMEM budget (explicit; v7x has only 64 MiB/TC) ---
    weight_bytes = sum(int(o.size) * o.dtype.itemsize for o in ops)
    io_bytes = 2 * tile_rows * (f_in + f_out_pad) * 4          # double-buffered x/out
    act_bytes = 4 * tile_rows * max(4 * f_mid, f_out_pad, f_in) * 4
    vmem_limit = int(min(max(int(1.5 * (weight_bytes + io_bytes + act_bytes)),
                             32 << 20), 64 << 20))

    # --- advisory cost estimate for the XLA scheduler ---
    mm_flops_per_row = sum(2 * o.shape[0] * o.shape[1]
                           for o in ops if o.ndim == 2 and o.shape[0] > 1)
    cost = pl.CostEstimate(
        flops=int(rows_pad * mm_flops_per_row),
        transcendentals=int(rows_pad * (1 + num_iter)),   # one rsqrt per LN row
        bytes_accessed=int(x.size * 4 + rows_pad * f_out_pad * 4 + weight_bytes),
    )

    y = pl.pallas_call(
        _make_kernel(num_iter),
        grid=(num_tiles,),
        in_specs=in_specs,
        out_specs=out_spec,
        out_shape=jax.ShapeDtypeStruct((rows_pad, f_out_pad), jnp.float32),
        compiler_params=pltpu.CompilerParams(
            dimension_semantics=("parallel",),   # megacore sharding when >1 tile
            vmem_limit_bytes=vmem_limit),
        cost_estimate=cost,
    )(x, *ops)

    y = y[:rows, :f_out]
    return {'a': y[:n_a], 'b': y[n_a:]}


def init_params(key, f_in, f_mid, f_out, num_iter=2):
    """Synthetic init matching the nn.Module parameter shapes
    (Linear weights stored pre-transposed as (in_features, out_features))."""
    def linear(k, fi, fo):
        kw, kb = jax.random.split(k)
        w = jax.random.normal(kw, (fi, fo), jnp.float32) / jnp.sqrt(fi)
        b = jax.random.normal(kb, (1, fo), jnp.float32) * 0.01
        return w, b

    keys = jax.random.split(key, 2 + 3 * num_iter)
    f_it = 4 * f_mid  # DictIteration(f_mid, 4*f_mid, f_mid)
    iters = []
    for i in range(num_iter):
        k1, k2, k3 = keys[2 + 3 * i: 5 + 3 * i]
        w1, b1 = linear(k1, f_mid, f_it)
        w2, b2 = linear(k2, f_it, f_it)
        g = jnp.ones((1, f_it), jnp.float32)    # LayerNorm weight (default)
        be = jnp.zeros((1, f_it), jnp.float32)  # LayerNorm bias   (default)
        w3, b3 = linear(k3, f_it, f_mid)
        iters.append((w1, b1, w2, b2, g, be, w3, b3))

    return {
        'ln_in': (jnp.ones((1, f_in), jnp.float32),
                  jnp.zeros((1, f_in), jnp.float32)),
        'proj_in': linear(keys[0], f_in, f_mid),
        'iters': iters,
        'proj_out': linear(keys[1], f_mid, f_out),
    }


def ref_forward(batch, params):
    """Pure-JAX f32 reference of DictStack.forward (checkpoint=False path)."""
    def ln(x, g, b):
        m = x.mean(-1, keepdims=True)
        v = ((x - m) ** 2).mean(-1, keepdims=True)
        return (x - m) / jnp.sqrt(v + LN_EPS) * g + b

    def op(x):
        g_in, b_in = params['ln_in']
        wp, bp = params['proj_in']
        wo, bo = params['proj_out']
        h = jnp.maximum(ln(x, g_in, b_in) @ wp + bp, 0.0)
        for (w1, b1, w2, b2, g, be, w3, b3) in params['iters']:
            h = jnp.maximum(h @ w1 + b1, 0.0)
            h = jnp.maximum(h @ w2 + b2, 0.0)
            h = ln(h, g, be)
            h = h @ w3 + b3
        return h @ wo + bo

    return {'a': op(batch['a']), 'b': op(batch['b'])}


if __name__ == "__main__":
    f_in, f_mid, f_out, num_iter = 32, 64, 16, 2
    n = 8  # rows per dict entry

    key = jax.random.PRNGKey(0)
    k_params, ka, kb = jax.random.split(key, 3)
    params = init_params(k_params, f_in, f_mid, f_out, num_iter)
    prepared = prepare_params(params)   # one-time: fold LN, bf16-cast, pad

    batch = {
        'a': jax.random.normal(ka, (n, f_in), jnp.float32),
        'b': jax.random.normal(kb, (n, f_in), jnp.float32),
    }

    out = dict_stack_forward(batch, prepared)
    jax.block_until_ready(out)

    ref = ref_forward(batch, params)
    for k in ('a', 'b'):
        assert out[k].shape == (n, f_out)
        # bf16 matmul operands / activations with f32 accumulation:
        # intentional precision trade -> loosened tolerance.
        assert jnp.allclose(out[k], ref[k], atol=5e-2, rtol=5e-2), (
            k, float(jnp.max(jnp.abs(out[k] - ref[k]))))

    print("KERNEL_OK")
</pallas_src>

<mosaic_0001>
module attributes {stable_mosaic.version = 11 : i64} {
  func.func @kernel(%arg0: i32, %arg1: memref<16x32xf32, #tpu.memory_space<vmem>>, %arg2: memref<32x64xbf16, #tpu.memory_space<vmem>>, %arg3: memref<1x64xf32, #tpu.memory_space<vmem>>, %arg4: memref<64x256xbf16, #tpu.memory_space<vmem>>, %arg5: memref<1x256xf32, #tpu.memory_space<vmem>>, %arg6: memref<256x256xbf16, #tpu.memory_space<vmem>>, %arg7: memref<1x256xf32, #tpu.memory_space<vmem>>, %arg8: memref<256x64xbf16, #tpu.memory_space<vmem>>, %arg9: memref<1x64xf32, #tpu.memory_space<vmem>>, %arg10: memref<64x256xbf16, #tpu.memory_space<vmem>>, %arg11: memref<1x256xf32, #tpu.memory_space<vmem>>, %arg12: memref<256x256xbf16, #tpu.memory_space<vmem>>, %arg13: memref<1x256xf32, #tpu.memory_space<vmem>>, %arg14: memref<256x64xbf16, #tpu.memory_space<vmem>>, %arg15: memref<1x64xf32, #tpu.memory_space<vmem>>, %arg16: memref<64x128xbf16, #tpu.memory_space<vmem>>, %arg17: memref<1x128xf32, #tpu.memory_space<vmem>>, %arg18: memref<16x128xf32, #tpu.memory_space<vmem>>) attributes {dimension_semantics = [#tpu.dimension_semantics<parallel>], iteration_bounds = array<i64: 1>, scalar_prefetch = 0 : i64, scratch_operands = 0 : i64, tpu.core_type = #tpu.core_type<tc>, window_params = [{transform_indices = @transform_0, window_bounds = array<i64: 16, 32>}, {pipeline_mode = #tpu.pipeline_mode<synchronous>, transform_indices = @transform_1, window_bounds = array<i64: 32, 64>}, {pipeline_mode = #tpu.pipeline_mode<synchronous>, transform_indices = @transform_2, window_bounds = array<i64: 1, 64>}, {pipeline_mode = #tpu.pipeline_mode<synchronous>, transform_indices = @transform_3, window_bounds = array<i64: 64, 256>}, {pipeline_mode = #tpu.pipeline_mode<synchronous>, transform_indices = @transform_4, window_bounds = array<i64: 1, 256>}, {pipeline_mode = #tpu.pipeline_mode<synchronous>, transform_indices = @transform_5, window_bounds = array<i64: 256, 256>}, {pipeline_mode = #tpu.pipeline_mode<synchronous>, transform_indices = @transform_6, window_bounds = array<i64: 1, 256>}, {pipeline_mode = #tpu.pipeline_mode<synchronous>, transform_indices = @transform_7, window_bounds = array<i64: 256, 64>}, {pipeline_mode = #tpu.pipeline_mode<synchronous>, transform_indices = @transform_8, window_bounds = array<i64: 1, 64>}, {pipeline_mode = #tpu.pipeline_mode<synchronous>, transform_indices = @transform_9, window_bounds = array<i64: 64, 256>}, {pipeline_mode = #tpu.pipeline_mode<synchronous>, transform_indices = @transform_10, window_bounds = array<i64: 1, 256>}, {pipeline_mode = #tpu.pipeline_mode<synchronous>, transform_indices = @transform_11, window_bounds = array<i64: 256, 256>}, {pipeline_mode = #tpu.pipeline_mode<synchronous>, transform_indices = @transform_12, window_bounds = array<i64: 1, 256>}, {pipeline_mode = #tpu.pipeline_mode<synchronous>, transform_indices = @transform_13, window_bounds = array<i64: 256, 64>}, {pipeline_mode = #tpu.pipeline_mode<synchronous>, transform_indices = @transform_14, window_bounds = array<i64: 1, 64>}, {pipeline_mode = #tpu.pipeline_mode<synchronous>, transform_indices = @transform_15, window_bounds = array<i64: 64, 128>}, {pipeline_mode = #tpu.pipeline_mode<synchronous>, transform_indices = @transform_16, window_bounds = array<i64: 1, 128>}, {transform_indices = @transform_17, window_bounds = array<i64: 16, 128>}]} {
    %c0 = arith.constant 0 : index
    %c0_0 = arith.constant 0 : index
    %0 = vector.load %arg1[%c0, %c0_0] : memref<16x32xf32, #tpu.memory_space<vmem>>, vector<16x32xf32>
    %cst = arith.constant dense<0.000000e+00> : vector<16xf32>
    %1 = vector.multi_reduction <add>, %0, %cst [1] : vector<16x32xf32> to vector<16xf32>
    %2 = vector.shape_cast %1 : vector<16xf32> to vector<16x1xf32>
    %cst_1 = arith.constant 3.200000e+01 : f32
    %3 = vector.broadcast %cst_1 : f32 to vector<16x1xf32>
    %4 = arith.divf %2, %3 : vector<16x1xf32>
    %5 = vector.broadcast %4 : vector<16x1xf32> to vector<16x32xf32>
    %6 = arith.subf %0, %5 : vector<16x32xf32>
    %7 = arith.mulf %6, %6 : vector<16x32xf32>
    %cst_2 = arith.constant dense<0.000000e+00> : vector<16xf32>
    %8 = vector.multi_reduction <add>, %7, %cst_2 [1] : vector<16x32xf32> to vector<16xf32>
    %9 = vector.shape_cast %8 : vector<16xf32> to vector<16x1xf32>
    %cst_3 = arith.constant 3.200000e+01 : f32
    %10 = vector.broadcast %cst_3 : f32 to vector<16x1xf32>
    %11 = arith.divf %9, %10 : vector<16x1xf32>
    %12 = vector.broadcast %4 : vector<16x1xf32> to vector<16x32xf32>
    %13 = arith.subf %0, %12 : vector<16x32xf32>
    %cst_4 = arith.constant 9.99999974E-6 : f32
    %14 = vector.broadcast %cst_4 : f32 to vector<16x1xf32>
    %15 = arith.addf %11, %14 : vector<16x1xf32>
    %16 = math.rsqrt %15 : vector<16x1xf32>
    %17 = vector.broadcast %16 : vector<16x1xf32> to vector<16x32xf32>
    %18 = arith.mulf %13, %17 : vector<16x32xf32>
    %19 = arith.truncf %18 : vector<16x32xf32> to vector<16x32xbf16>
    %c0_5 = arith.constant 0 : index
    %c0_6 = arith.constant 0 : index
    %20 = vector.load %arg2[%c0_5, %c0_6] : memref<32x64xbf16, #tpu.memory_space<vmem>>, vector<32x64xbf16>
    %cst_7 = arith.constant dense<0.000000e+00> : vector<16x64xf32>
    %21 = tpu.matmul %19, %20, %cst_7 {dimension_numbers = #tpu.dot_dimension_numbers<[1], [0], [0], [1], [0, 0, 1, 1], [], []>} : vector<16x32xbf16>, vector<32x64xbf16>, vector<16x64xf32> -> vector<16x64xf32>
    %c0_8 = arith.constant 0 : index
    %c0_9 = arith.constant 0 : index
    %22 = vector.load %arg3[%c0_8, %c0_9] : memref<1x64xf32, #tpu.memory_space<vmem>>, vector<1x64xf32>
    %23 = vector.broadcast %22 : vector<1x64xf32> to vector<16x64xf32>
    %24 = arith.addf %21, %23 : vector<16x64xf32>
    %cst_10 = arith.constant 0.000000e+00 : f32
    %25 = vector.broadcast %cst_10 : f32 to vector<16x64xf32>
    %26 = arith.maximumf %24, %25 : vector<16x64xf32>
    %27 = arith.truncf %26 : vector<16x64xf32> to vector<16x64xbf16>
    %c0_11 = arith.constant 0 : index
    %c0_12 = arith.constant 0 : index
    %28 = vector.load %arg4[%c0_11, %c0_12] : memref<64x256xbf16, #tpu.memory_space<vmem>>, vector<64x256xbf16>
    %cst_13 = arith.constant dense<0.000000e+00> : vector<16x256xf32>
    %29 = tpu.matmul %27, %28, %cst_13 {dimension_numbers = #tpu.dot_dimension_numbers<[1], [0], [0], [1], [0, 0, 1, 1], [], []>} : vector<16x64xbf16>, vector<64x256xbf16>, vector<16x256xf32> -> vector<16x256xf32>
    %c0_14 = arith.constant 0 : index
    %c0_15 = arith.constant 0 : index
    %30 = vector.load %arg5[%c0_14, %c0_15] : memref<1x256xf32, #tpu.memory_space<vmem>>, vector<1x256xf32>
    %31 = vector.broadcast %30 : vector<1x256xf32> to vector<16x256xf32>
    %32 = arith.addf %29, %31 : vector<16x256xf32>
    %cst_16 = arith.constant 0.000000e+00 : f32
    %33 = vector.broadcast %cst_16 : f32 to vector<16x256xf32>
    %34 = arith.maximumf %32, %33 : vector<16x256xf32>
    %35 = arith.truncf %34 : vector<16x256xf32> to vector<16x256xbf16>
    %c0_17 = arith.constant 0 : index
    %c0_18 = arith.constant 0 : index
    %36 = vector.load %arg6[%c0_17, %c0_18] : memref<256x256xbf16, #tpu.memory_space<vmem>>, vector<256x256xbf16>
    %cst_19 = arith.constant dense<0.000000e+00> : vector<16x256xf32>
    %37 = tpu.matmul %35, %36, %cst_19 {dimension_numbers = #tpu.dot_dimension_numbers<[1], [0], [0], [1], [0, 0, 1, 1], [], []>} : vector<16x256xbf16>, vector<256x256xbf16>, vector<16x256xf32> -> vector<16x256xf32>
    %c0_20 = arith.constant 0 : index
    %c0_21 = arith.constant 0 : index
    %38 = vector.load %arg7[%c0_20, %c0_21] : memref<1x256xf32, #tpu.memory_space<vmem>>, vector<1x256xf32>
    %39 = vector.broadcast %38 : vector<1x256xf32> to vector<16x256xf32>
    %40 = arith.addf %37, %39 : vector<16x256xf32>
    %cst_22 = arith.constant 0.000000e+00 : f32
    %41 = vector.broadcast %cst_22 : f32 to vector<16x256xf32>
    %42 = arith.maximumf %40, %41 : vector<16x256xf32>
    %cst_23 = arith.constant dense<0.000000e+00> : vector<16xf32>
    %43 = vector.multi_reduction <add>, %42, %cst_23 [1] : vector<16x256xf32> to vector<16xf32>
    %44 = vector.shape_cast %43 : vector<16xf32> to vector<16x1xf32>
    %cst_24 = arith.constant 2.560000e+02 : f32
    %45 = vector.broadcast %cst_24 : f32 to vector<16x1xf32>
    %46 = arith.divf %44, %45 : vector<16x1xf32>
    %47 = vector.broadcast %46 : vector<16x1xf32> to vector<16x256xf32>
    %48 = arith.subf %42, %47 : vector<16x256xf32>
    %49 = arith.mulf %48, %48 : vector<16x256xf32>
    %cst_25 = arith.constant dense<0.000000e+00> : vector<16xf32>
    %50 = vector.multi_reduction <add>, %49, %cst_25 [1] : vector<16x256xf32> to vector<16xf32>
    %51 = vector.shape_cast %50 : vector<16xf32> to vector<16x1xf32>
    %cst_26 = arith.constant 2.560000e+02 : f32
    %52 = vector.broadcast %cst_26 : f32 to vector<16x1xf32>
    %53 = arith.divf %51, %52 : vector<16x1xf32>
    %54 = vector.broadcast %46 : vector<16x1xf32> to vector<16x256xf32>
    %55 = arith.subf %42, %54 : vector<16x256xf32>
    %cst_27 = arith.constant 9.99999974E-6 : f32
    %56 = vector.broadcast %cst_27 : f32 to vector<16x1xf32>
    %57 = arith.addf %53, %56 : vector<16x1xf32>
    %58 = math.rsqrt %57 : vector<16x1xf32>
    %59 = vector.broadcast %58 : vector<16x1xf32> to vector<16x256xf32>
    %60 = arith.mulf %55, %59 : vector<16x256xf32>
    %61 = arith.truncf %60 : vector<16x256xf32> to vector<16x256xbf16>
    %c0_28 = arith.constant 0 : index
    %c0_29 = arith.constant 0 : index
    %62 = vector.load %arg8[%c0_28, %c0_29] : memref<256x64xbf16, #tpu.memory_space<vmem>>, vector<256x64xbf16>
    %cst_30 = arith.constant dense<0.000000e+00> : vector<16x64xf32>
    %63 = tpu.matmul %61, %62, %cst_30 {dimension_numbers = #tpu.dot_dimension_numbers<[1], [0], [0], [1], [0, 0, 1, 1], [], []>} : vector<16x256xbf16>, vector<256x64xbf16>, vector<16x64xf32> -> vector<16x64xf32>
    %c0_31 = arith.constant 0 : index
    %c0_32 = arith.constant 0 : index
    %64 = vector.load %arg9[%c0_31, %c0_32] : memref<1x64xf32, #tpu.memory_space<vmem>>, vector<1x64xf32>
    %65 = vector.broadcast %64 : vector<1x64xf32> to vector<16x64xf32>
    %66 = arith.addf %63, %65 : vector<16x64xf32>
    %67 = arith.truncf %66 : vector<16x64xf32> to vector<16x64xbf16>
    %c0_33 = arith.constant 0 : index
    %c0_34 = arith.constant 0 : index
    %68 = vector.load %arg10[%c0_33, %c0_34] : memref<64x256xbf16, #tpu.memory_space<vmem>>, vector<64x256xbf16>
    %cst_35 = arith.constant dense<0.000000e+00> : vector<16x256xf32>
    %69 = tpu.matmul %67, %68, %cst_35 {dimension_numbers = #tpu.dot_dimension_numbers<[1], [0], [0], [1], [0, 0, 1, 1], [], []>} : vector<16x64xbf16>, vector<64x256xbf16>, vector<16x256xf32> -> vector<16x256xf32>
    %c0_36 = arith.constant 0 : index
    %c0_37 = arith.constant 0 : index
    %70 = vector.load %arg11[%c0_36, %c0_37] : memref<1x256xf32, #tpu.memory_space<vmem>>, vector<1x256xf32>
    %71 = vector.broadcast %70 : vector<1x256xf32> to vector<16x256xf32>
    %72 = arith.addf %69, %71 : vector<16x256xf32>
    %cst_38 = arith.constant 0.000000e+00 : f32
    %73 = vector.broadcast %cst_38 : f32 to vector<16x256xf32>
    %74 = arith.maximumf %72, %73 : vector<16x256xf32>
    %75 = arith.truncf %74 : vector<16x256xf32> to vector<16x256xbf16>
    %c0_39 = arith.constant 0 : index
    %c0_40 = arith.constant 0 : index
    %76 = vector.load %arg12[%c0_39, %c0_40] : memref<256x256xbf16, #tpu.memory_space<vmem>>, vector<256x256xbf16>
    %cst_41 = arith.constant dense<0.000000e+00> : vector<16x256xf32>
    %77 = tpu.matmul %75, %76, %cst_41 {dimension_numbers = #tpu.dot_dimension_numbers<[1], [0], [0], [1], [0, 0, 1, 1], [], []>} : vector<16x256xbf16>, vector<256x256xbf16>, vector<16x256xf32> -> vector<16x256xf32>
    %c0_42 = arith.constant 0 : index
    %c0_43 = arith.constant 0 : index
    %78 = vector.load %arg13[%c0_42, %c0_43] : memref<1x256xf32, #tpu.memory_space<vmem>>, vector<1x256xf32>
    %79 = vector.broadcast %78 : vector<1x256xf32> to vector<16x256xf32>
    %80 = arith.addf %77, %79 : vector<16x256xf32>
    %cst_44 = arith.constant 0.000000e+00 : f32
    %81 = vector.broadcast %cst_44 : f32 to vector<16x256xf32>
    %82 = arith.maximumf %80, %81 : vector<16x256xf32>
    %cst_45 = arith.constant dense<0.000000e+00> : vector<16xf32>
    %83 = vector.multi_reduction <add>, %82, %cst_45 [1] : vector<16x256xf32> to vector<16xf32>
    %84 = vector.shape_cast %83 : vector<16xf32> to vector<16x1xf32>
    %cst_46 = arith.constant 2.560000e+02 : f32
    %85 = vector.broadcast %cst_46 : f32 to vector<16x1xf32>
    %86 = arith.divf %84, %85 : vector<16x1xf32>
    %87 = vector.broadcast %86 : vector<16x1xf32> to vector<16x256xf32>
    %88 = arith.subf %82, %87 : vector<16x256xf32>
    %89 = arith.mulf %88, %88 : vector<16x256xf32>
    %cst_47 = arith.constant dense<0.000000e+00> : vector<16xf32>
    %90 = vector.multi_reduction <add>, %89, %cst_47 [1] : vector<16x256xf32> to vector<16xf32>
    %91 = vector.shape_cast %90 : vector<16xf32> to vector<16x1xf32>
    %cst_48 = arith.constant 2.560000e+02 : f32
    %92 = vector.broadcast %cst_48 : f32 to vector<16x1xf32>
    %93 = arith.divf %91, %92 : vector<16x1xf32>
    %94 = vector.broadcast %86 : vector<16x1xf32> to vector<16x256xf32>
    %95 = arith.subf %82, %94 : vector<16x256xf32>
    %cst_49 = arith.constant 9.99999974E-6 : f32
    %96 = vector.broadcast %cst_49 : f32 to vector<16x1xf32>
    %97 = arith.addf %93, %96 : vector<16x1xf32>
    %98 = math.rsqrt %97 : vector<16x1xf32>
    %99 = vector.broadcast %98 : vector<16x1xf32> to vector<16x256xf32>
    %100 = arith.mulf %95, %99 : vector<16x256xf32>
    %101 = arith.truncf %100 : vector<16x256xf32> to vector<16x256xbf16>
    %c0_50 = arith.constant 0 : index
    %c0_51 = arith.constant 0 : index
    %102 = vector.load %arg14[%c0_50, %c0_51] : memref<256x64xbf16, #tpu.memory_space<vmem>>, vector<256x64xbf16>
    %cst_52 = arith.constant dense<0.000000e+00> : vector<16x64xf32>
    %103 = tpu.matmul %101, %102, %cst_52 {dimension_numbers = #tpu.dot_dimension_numbers<[1], [0], [0], [1], [0, 0, 1, 1], [], []>} : vector<16x256xbf16>, vector<256x64xbf16>, vector<16x64xf32> -> vector<16x64xf32>
    %c0_53 = arith.constant 0 : index
    %c0_54 = arith.constant 0 : index
    %104 = vector.load %arg15[%c0_53, %c0_54] : memref<1x64xf32, #tpu.memory_space<vmem>>, vector<1x64xf32>
    %105 = vector.broadcast %104 : vector<1x64xf32> to vector<16x64xf32>
    %106 = arith.addf %103, %105 : vector<16x64xf32>
    %107 = arith.truncf %106 : vector<16x64xf32> to vector<16x64xbf16>
    %c0_55 = arith.constant 0 : index
    %c0_56 = arith.constant 0 : index
    %108 = vector.load %arg16[%c0_55, %c0_56] : memref<64x128xbf16, #tpu.memory_space<vmem>>, vector<64x128xbf16>
    %cst_57 = arith.constant dense<0.000000e+00> : vector<16x128xf32>
    %109 = tpu.matmul %107, %108, %cst_57 {dimension_numbers = #tpu.dot_dimension_numbers<[1], [0], [0], [1], [0, 0, 1, 1], [], []>} : vector<16x64xbf16>, vector<64x128xbf16>, vector<16x128xf32> -> vector<16x128xf32>
    %c0_58 = arith.constant 0 : index
    %c0_59 = arith.constant 0 : index
    %110 = vector.load %arg17[%c0_58, %c0_59] : memref<1x128xf32, #tpu.memory_space<vmem>>, vector<1x128xf32>
    %111 = vector.broadcast %110 : vector<1x128xf32> to vector<16x128xf32>
    %112 = arith.addf %109, %111 : vector<16x128xf32>
    %c0_60 = arith.constant 0 : index
    %c0_61 = arith.constant 0 : index
    %113 = vector.load %arg18[%c0_60, %c0_61] : memref<16x128xf32, #tpu.memory_space<vmem>>, vector<16x128xf32>
    tpu.vector_store %arg18[%c0_60, %c0_61], %112 {strides = array<i32>} : memref<16x128xf32, #tpu.memory_space<vmem>>, vector<16x128xf32>,
    return
  }
  func.func @transform_0(%arg0: i32) -> (i32, i32) {
    %c0_i32 = arith.constant 0 : i32
    %c0_i32_0 = arith.constant 0 : i32
    return %arg0, %c0_i32 : i32, i32
  }
  func.func @transform_1(%arg0: i32) -> (i32, i32) {
    %c0_i32 = arith.constant 0 : i32
    %c0_i32_0 = arith.constant 0 : i32
    %c0_i32_1 = arith.constant 0 : i32
    return %c0_i32, %c0_i32_0 : i32, i32
  }
  func.func @transform_2(%arg0: i32) -> (i32, i32) {
    %c0_i32 = arith.constant 0 : i32
    %c0_i32_0 = arith.constant 0 : i32
    %c0_i32_1 = arith.constant 0 : i32
    return %c0_i32, %c0_i32_0 : i32, i32
  }
  func.func @transform_3(%arg0: i32) -> (i32, i32) {
    %c0_i32 = arith.constant 0 : i32
    %c0_i32_0 = arith.constant 0 : i32
    %c0_i32_1 = arith.constant 0 : i32
    return %c0_i32, %c0_i32_0 : i32, i32
  }
  func.func @transform_4(%arg0: i32) -> (i32, i32) {
    %c0_i32 = arith.constant 0 : i32
    %c0_i32_0 = arith.constant 0 : i32
    %c0_i32_1 = arith.constant 0 : i32
    return %c0_i32, %c0_i32_0 : i32, i32
  }
  func.func @transform_5(%arg0: i32) -> (i32, i32) {
    %c0_i32 = arith.constant 0 : i32
    %c0_i32_0 = arith.constant 0 : i32
    %c0_i32_1 = arith.constant 0 : i32
    return %c0_i32, %c0_i32_0 : i32, i32
  }
  func.func @transform_6(%arg0: i32) -> (i32, i32) {
    %c0_i32 = arith.constant 0 : i32
    %c0_i32_0 = arith.constant 0 : i32
    %c0_i32_1 = arith.constant 0 : i32
    return %c0_i32, %c0_i32_0 : i32, i32
  }
  func.func @transform_7(%arg0: i32) -> (i32, i32) {
    %c0_i32 = arith.constant 0 : i32
    %c0_i32_0 = arith.constant 0 : i32
    %c0_i32_1 = arith.constant 0 : i32
    return %c0_i32, %c0_i32_0 : i32, i32
  }
  func.func @transform_8(%arg0: i32) -> (i32, i32) {
    %c0_i32 = arith.constant 0 : i32
    %c0_i32_0 = arith.constant 0 : i32
    %c0_i32_1 = arith.constant 0 : i32
    return %c0_i32, %c0_i32_0 : i32, i32
  }
  func.func @transform_9(%arg0: i32) -> (i32, i32) {
    %c0_i32 = arith.constant 0 : i32
    %c0_i32_0 = arith.constant 0 : i32
    %c0_i32_1 = arith.constant 0 : i32
    return %c0_i32, %c0_i32_0 : i32, i32
  }
  func.func @transform_10(%arg0: i32) -> (i32, i32) {
    %c0_i32 = arith.constant 0 : i32
    %c0_i32_0 = arith.constant 0 : i32
    %c0_i32_1 = arith.constant 0 : i32
    return %c0_i32, %c0_i32_0 : i32, i32
  }
  func.func @transform_11(%arg0: i32) -> (i32, i32) {
    %c0_i32 = arith.constant 0 : i32
    %c0_i32_0 = arith.constant 0 : i32
    %c0_i32_1 = arith.constant 0 : i32
    return %c0_i32, %c0_i32_0 : i32, i32
  }
  func.func @transform_12(%arg0: i32) -> (i32, i32) {
    %c0_i32 = arith.constant 0 : i32
    %c0_i32_0 = arith.constant 0 : i32
    %c0_i32_1 = arith.constant 0 : i32
    return %c0_i32, %c0_i32_0 : i32, i32
  }
  func.func @transform_13(%arg0: i32) -> (i32, i32) {
    %c0_i32 = arith.constant 0 : i32
    %c0_i32_0 = arith.constant 0 : i32
    %c0_i32_1 = arith.constant 0 : i32
    return %c0_i32, %c0_i32_0 : i32, i32
  }
  func.func @transform_14(%arg0: i32) -> (i32, i32) {
    %c0_i32 = arith.constant 0 : i32
    %c0_i32_0 = arith.constant 0 : i32
    %c0_i32_1 = arith.constant 0 : i32
    return %c0_i32, %c0_i32_0 : i32, i32
  }
  func.func @transform_15(%arg0: i32) -> (i32, i32) {
    %c0_i32 = arith.constant 0 : i32
    %c0_i32_0 = arith.constant 0 : i32
    %c0_i32_1 = arith.constant 0 : i32
    return %c0_i32, %c0_i32_0 : i32, i32
  }
  func.func @transform_16(%arg0: i32) -> (i32, i32) {
    %c0_i32 = arith.constant 0 : i32
    %c0_i32_0 = arith.constant 0 : i32
    %c0_i32_1 = arith.constant 0 : i32
    return %c0_i32, %c0_i32_0 : i32, i32
  }
  func.func @transform_17(%arg0: i32) -> (i32, i32) {
    %c0_i32 = arith.constant 0 : i32
    %c0_i32_0 = arith.constant 0 : i32
    return %arg0, %c0_i32 : i32, i32
  }
}

</mosaic_0001>

<bundles_post_ra>
// kernel: tpu_custom_call.1
= control target key start
LH: loop header
LB: loop body
LE: loop exit
PB: predicated region body
PF: predicated region fallthrough
CT: control target
= control target key end

     0   :  { %s2516_s0 = inlined_call_operand.hbm [shape: f32[16,32], index: 0, kind: input, shape index: {}]   ;;  %s2517_s1 = inlined_call_operand.hbm [shape: bf16[32,64], index: 1, kind: input, shape index: {}]   ;;  %s2518_s2 = inlined_call_operand.vmem [shape: f32[1,64], index: 2, kind: input, shape index: {}]   ;;  %s2519_s3 = inlined_call_operand.vmem [shape: bf16[64,256], index: 3, kind: input, shape index: {}]   ;;  %s2520_s4 = inlined_call_operand.vmem [shape: f32[1,256], index: 4, kind: input, shape index: {}]   ;;  %s2521_s5 = inlined_call_operand.vmem [shape: bf16[256,256], index: 5, kind: input, shape index: {}]   ;;  %s2522_s6 = inlined_call_operand.vmem [shape: f32[1,256], index: 6, kind: input, shape index: {}]   ;;  %s2523_s7 = inlined_call_operand.vmem [shape: bf16[256,64], index: 7, kind: input, shape index: {}]   ;;  %s2524_s8 = inlined_call_operand.hbm [shape: f32[1,64], index: 8, kind: input, shape index: {}]   ;;  %s2525_s9 = inlined_call_operand.hbm [shape: bf16[64,256], index: 9, kind: input, shape index: {}]   ;;  %s2526_s10 = inlined_call_operand.hbm [shape: f32[1,256], index: 10, kind: input, shape index: {}]   ;;  %s2527_s11 = inlined_call_operand.hbm [shape: bf16[256,256], index: 11, kind: input, shape index: {}]   ;;  %s2528_s12 = inlined_call_operand.vmem [shape: f32[1,256], index: 12, kind: input, shape index: {}]   ;;  %s2529_s13 = inlined_call_operand.vmem [shape: bf16[256,64], index: 13, kind: input, shape index: {}]   ;;  %s2530_s14 = inlined_call_operand.vmem [shape: f32[1,64], index: 14, kind: input, shape index: {}]   ;;  %s2531_s15 = inlined_call_operand.vmem [shape: bf16[64,128], index: 15, kind: input, shape index: {}]   ;;  %s2532_s16 = inlined_call_operand.vmem [shape: f32[1,128], index: 16, kind: input, shape index: {}]   ;;  %s2533_s17 = inlined_call_operand.hbm [shape: f32[16,128], index: 17, kind: output, shape index: {}]  }
   0x1   :  { %2537 = sst [smem:[#allocation19_spill]] %s2516_s0 }
   0x2   :  { %2538 = sst [smem:[#allocation20_spill]] %s2517_s1 }
   0x3   :  { %2539 = sst [smem:[#allocation21_spill]] %s2532_s16 }
   0x4   :  { %2540 = sst [smem:[#allocation22_spill]] %s2533_s17 }
   0x5   :  { %22 = vsyncpa [#allocation3], 0 }
   0x6   :  { %23 = vsyncpa [#allocation6], 0 }
   0x7   :  { %24 = vsyncpa [#allocation9], 0 }
   0x8   :  { %25 = vsyncpa [#allocation12], 0 }
   0x9   :  { %26 = vsyncpa [#allocation4], 0  ;;  %s2038_s24 = smov [#allocation5]   ;;  %s2541_s28 = sld [smem:[#allocation20_spill]] }
   0xa   :  { %s44_s25 = sshll.u32 %s2038_s24, 4  ;;  %s45_s25 = int_to_ptr.vmem [resolvable:$true] %s44_s25 }
   0xf   :  { %s1874_s29 = scalar_lea.hbm %s2541_s28, 256 }
  0x10   :  { %p1875_p0 = scmp.ne.s32.totalorder %s2541_s28, %s1874_s29  ;;  %p1878_p1 = scmp.lt.u32.totalorder %s1874_s29, %s2541_s28 }
  0x12   :  { %p1880_p2 = pnand %p1878_p1, %p1875_p0 }
  0x14   :  { %1883 = shalt.err (!%p1880_p2)
}
  0x15   :  { %s1884_s1 = scalar_lea.vmem %s45_s25, 256  ;;  %p1889_p4 = scmp.lt.s32.totalorder %s45_s25, %s45_s25 }
  0x16   :  { %p1885_p3 = scmp.ne.s32.totalorder %s45_s25, %s1884_s1  ;;  %p1890_p5 = scmp.lt.s32.totalorder %s1884_s1, %s1884_s1 }
  0x18   :  { %p1891_p6 = por %p1890_p5, %p1889_p4 }
  0x1a   :  { %p1892_p7 = pnand %p1891_p6, %p1885_p3 }
  0x1c   :  { %1895 = shalt.err (!%p1892_p7)
}
  0x1d   :  { %s2039_s20 = smov 64   ;;  %s2040_s21 = smov 4  }
  0x1e   :  { %50 = dma.hbm_to_vmem [thread:$0]  %s2541_s28, 256, %s45_s25, [#allocation6], %s2039_s20, %s2039_s20, %s2040_s21  }
  0x1f   :  { %s2041_s24 = smov [#allocation8]   ;;  %s2042_s27 = smov [#allocation2]  }
  0x20   :  { %s78_s26 = sshll.u32 %s2041_s24, 4  ;;  %s32_s29 = sshll.u32 %s2042_s27, 4  ;;  %s79_s26 = int_to_ptr.vmem [resolvable:$true] %s78_s26  ;;  %s33_s29 = int_to_ptr.vmem [resolvable:$true] %s32_s29 }
  0x21   :  { %s1896_s18 = scalar_lea.hbm %s2525_s9, 1024 }
  0x22   :  { %p1897_p8 = scmp.ne.s32.totalorder %s2525_s9, %s1896_s18  ;;  %p1900_p9 = scmp.lt.u32.totalorder %s1896_s18, %s2525_s9 }
  0x24   :  { %p1902_p10 = pnand %p1900_p9, %p1897_p8 }
  0x26   :  { %1905 = shalt.err (!%p1902_p10)
}
  0x27   :  { %s1906_s25 = scalar_lea.vmem %s79_s26, 1024  ;;  %p1911_p12 = scmp.lt.s32.totalorder %s79_s26, %s79_s26 }
  0x28   :  { %p1907_p11 = scmp.ne.s32.totalorder %s79_s26, %s1906_s25  ;;  %p1912_p13 = scmp.lt.s32.totalorder %s1906_s25, %s1906_s25 }
  0x2a   :  { %p1913_p0 = por %p1912_p13, %p1911_p12 }
  0x2c   :  { %p1914_p1 = pnand %p1913_p0, %p1907_p11 }
  0x2e   :  { %1917 = shalt.err (!%p1914_p1)
}
  0x2f   :  { %s2043_s28 = smov 128   ;;  %s2044_s20 = smov 8  }
  0x30   :  { %84 = dma.hbm_to_vmem [thread:$0]  %s2525_s9, 1024, %s79_s26, [#allocation9], %s2043_s28, %s2043_s28, %s2044_s20  }
  0x31   :  { %s2542_s23 = sld [smem:[#allocation19_spill]] }
  0x37   :  { %s1918_s24 = scalar_lea.hbm %s2542_s23, 256 }
  0x38   :  { %p1919_p2 = scmp.ne.s32.totalorder %s2542_s23, %s1918_s24  ;;  %p1922_p3 = scmp.lt.u32.totalorder %s1918_s24, %s2542_s23 }
  0x3a   :  { %p1924_p4 = pnand %p1922_p3, %p1919_p2 }
  0x3c   :  { %1927 = shalt.err (!%p1924_p4)
}
  0x3d   :  { %s1928_s19 = scalar_lea.vmem %s33_s29, 256  ;;  %p1933_p6 = scmp.lt.s32.totalorder %s33_s29, %s33_s29 }
  0x3e   :  { %p1929_p5 = scmp.ne.s32.totalorder %s33_s29, %s1928_s19  ;;  %p1934_p7 = scmp.lt.s32.totalorder %s1928_s19, %s1928_s19 }
  0x40   :  { %p1935_p8 = por %p1934_p7, %p1933_p6 }
  0x42   :  { %p1936_p9 = pnand %p1935_p8, %p1929_p5 }
  0x44   :  { %1939 = shalt.err (!%p1936_p9)
}
  0x45   :  { %38 = dma.hbm_to_vmem [thread:$0]  %s2542_s23, 256, %s33_s29, [#allocation3], %s2043_s28, %s2043_s28, %s2044_s20  }
  0x46   :  { %s2045_s1 = smov [#allocation7]   ;;  %s2046_s21 = smov [#allocation10]  }
  0x47   :  { %s69_s25 = sshll.u32 %s2045_s1, 4  ;;  %s91_s22 = sshll.u32 %s2046_s21, 4  ;;  %s70_s25 = int_to_ptr.vmem [resolvable:$true] %s69_s25  ;;  %s92_s22 = int_to_ptr.vmem [resolvable:$true] %s91_s22 }
  0x48   :  { %s1940_s24 = scalar_lea.hbm %s2524_s8, 16 }
  0x49   :  { %p1941_p10 = scmp.ne.s32.totalorder %s2524_s8, %s1940_s24  ;;  %p1944_p11 = scmp.lt.u32.totalorder %s1940_s24, %s2524_s8 }
  0x4b   :  { %p1946_p12 = pnand %p1944_p11, %p1941_p10 }
  0x4d   :  { %1949 = shalt.err (!%p1946_p12)
}
  0x4e   :  { %s1950_s29 = scalar_lea.vmem %s70_s25, 16  ;;  %s1954_s23 = scalar_lea.vmem %s70_s25, 32 }
  0x4f   :  { %p1951_p13 = scmp.ne.s32.totalorder %s70_s25, %s1950_s29  ;;  %p1955_p0 = scmp.lt.s32.totalorder %s70_s25, %s70_s25 }
  0x50   :  { %p1956_p1 = scmp.lt.s32.totalorder %s1954_s23, %s1950_s29 }
  0x52   :  { %p1957_p2 = por %p1956_p1, %p1955_p0 }
  0x54   :  { %p1958_p3 = pnand %p1957_p2, %p1951_p13 }
  0x56   :  { %1961 = shalt.err (!%p1958_p3)
}
  0x57   :  { %72 = dma.hbm_to_vmem [thread:$0]  %s2524_s8, 16, %s70_s25, [#allocation6]  }
  0x58   :  { %s1962_s21 = scalar_lea.hbm %s2526_s10, 32 }
  0x59   :  { %p1963_p4 = scmp.ne.s32.totalorder %s2526_s10, %s1962_s21  ;;  %p1966_p5 = scmp.lt.u32.totalorder %s1962_s21, %s2526_s10 }
  0x5b   :  { %p1968_p6 = pnand %p1966_p5, %p1963_p4 }
  0x5d   :  { %1971 = shalt.err (!%p1968_p6)
}
  0x5e   :  { %s1972_s0 = scalar_lea.vmem %s92_s22, 32  ;;  %p1977_p8 = scmp.lt.s32.totalorder %s92_s22, %s92_s22 }
  0x5f   :  { %p1973_p7 = scmp.ne.s32.totalorder %s92_s22, %s1972_s0  ;;  %p1978_p9 = scmp.lt.s32.totalorder %s1972_s0, %s1972_s0 }
  0x61   :  { %p1979_p10 = por %p1978_p9, %p1977_p8 }
  0x63   :  { %p1980_p11 = pnand %p1979_p10, %p1973_p7 }
  0x65   :  { %1983 = shalt.err (!%p1980_p11)
}
  0x66   :  { %94 = dma.hbm_to_vmem [thread:$0]  %s2526_s10, 32, %s92_s22, [#allocation9]  }
  0x67   :  { %s2047_s30 = smov [#allocation11]   ;;  %s1984_s19 = scalar_lea.hbm %s2527_s11, 4096 }
  0x68   :  { %s100_s18 = sshll.u32 %s2047_s30, 4  ;;  %p1985_p12 = scmp.ne.s32.totalorder %s2527_s11, %s1984_s19  ;;  %s101_s18 = int_to_ptr.vmem [resolvable:$true] %s100_s18 }
  0x69   :  { %p1988_p13 = scmp.lt.u32.totalorder %s1984_s19, %s2527_s11 }
  0x6b   :  { %p1990_p0 = pnand %p1988_p13, %p1985_p12 }
  0x6d   :  { %1993 = shalt.err (!%p1990_p0)
}
  0x6e   :  { %s1994_s16 = scalar_lea.vmem %s101_s18, 4096  ;;  %p1999_p2 = scmp.lt.s32.totalorder %s101_s18, %s101_s18 }
  0x6f   :  { %p1995_p1 = scmp.ne.s32.totalorder %s101_s18, %s1994_s16  ;;  %p2000_p3 = scmp.lt.s32.totalorder %s1994_s16, %s1994_s16 }
  0x71   :  { %p2001_p4 = por %p2000_p3, %p1999_p2 }
  0x73   :  { %p2002_p5 = pnand %p2001_p4, %p1995_p1 }
  0x75   :  { %2005 = shalt.err (!%p2002_p5)
}
  0x76   :  { %106 = dma.hbm_to_vmem [thread:$0]  %s2527_s11, 4096, %s101_s18, [#allocation12], %s2043_s28, %s2043_s28, %s2044_s20  }
  0x77   :  { %2028 = dma.done.wait [#allocation3], 256  }
  0x78   :  { %2029 = vsyncadd [#allocation3], 4294967040 }
  0x79   :  { %2030 = dma.done.wait [#allocation6], 272  }
  0x7a   :  { %2031 = vsyncadd [#allocation6], 4294967024 }
  0x7b   :  { %2032 = dma.done.wait [#allocation9], 1056  }
  0x7c   :  { %2033 = vsyncadd [#allocation9], 4294966240 }
  0x7d   :  { %2034 = dma.done.wait [#allocation12], 4096  }
  0x7e   :  { %2035 = vsyncadd [#allocation12], 4294963200  ;;  %vm138_vm0 = vcmask 261120   ;;  %v136_v0 = vld [vmem:[#allocation2] sm:$0xff]  ;;  %v137_v1 = vld [vmem:[#allocation2 + $0x8] sm:$0xff]  ;;  %v2048_v15 = vmov 0.0  }
  0x7f   :  { %v139_v2 = vsel %vm138_vm0, %v136_v0, 0.0  ;;  %v142_v3 = vsel %vm138_vm0, %v137_v1, 0.0  ;;  %v1704_v14 = vld [vmem:[#allocation5] sm:$0xff]   ;;  %1670 = vmatprep.subr.bf16.mxu0 %v2048_v15  ;;  %vm2049_vm1 = vmmov 0   ;;  %v1705_v16 = vld [vmem:[#allocation5 + $0x8] sm:$0xff]   ;;  %v2050_v36 = vmov 0  }
  0x80   :  { %140 = vadd.xlane.f32.xlu0 %v139_v2  ;;  %1674 = vmatprep.mubr.msk.bf16.mxu0 %vm2049_vm1, %v2048_v15  ;;  %v1706_v17 = vld [vmem:[%s2519_s3 + $0x4] ss:$8 sps:$4 sm:$0xff]   ;;  %v1708_v18 = vld [vmem:[%s2519_s3] ss:$8 sps:$4 sm:$0xff]   ;;  %v1709_v19 = vld [vmem:[%s2519_s3 + $0x14] ss:$8 sps:$4 sm:$0xff]  }
  0x81   :  { %1671 = vmatpush3.bf16.msra.mxu0 %v1704_v14  ;;  %301 = vmatprep.subr.bf16.mxu1 %v1706_v17  ;;  %v1711_v20 = vld [vmem:[%s2519_s3 + $0x10] ss:$8 sps:$4 sm:$0xff]   ;;  %v1712_v32 = vld [vmem:[%s2519_s3 + $0x24] ss:$8 sps:$4 sm:$0xff]   ;;  %v1714_v33 = vld [vmem:[%s2519_s3 + $0x20] ss:$8 sps:$4 sm:$0xff]  }
  0x82   :  { %1672 = vmatprep.subr.bf16.mxu0 %v2048_v15  ;;  %302 = vmatpush1.bf16.msra.mxu1 %v1708_v18  ;;  %v1715_v34 = vld [vmem:[%s2519_s3 + $0x34] ss:$8 sps:$4 sm:$0xff]   ;;  %v1717_v35 = vld [vmem:[%s2519_s3 + $0x30] ss:$8 sps:$4 sm:$0xff]   ;;  %v1718_v37 = vld [vmem:[%s2521_s5] ss:$8 sps:$4 sm:$0xff]  }
  0x83   :  { %303 = vmatprep.subr.bf16.mxu1 %v1709_v19  ;;  %333 = vmatprep.mubr.bf16.mxu1 %v2050_v36  ;;  %v1720_v38 = vld [vmem:[%s2521_s5 + $0x4] ss:$8 sps:$4 sm:$0xff]   ;;  %v1723_v39 = vld [vmem:[%s2521_s5 + $0x14] ss:$8 sps:$4 sm:$0xff]   ;;  %v1721_v40 = vld [vmem:[%s2521_s5 + $0x10] ss:$8 sps:$4 sm:$0xff]  }
  0x84   :  { %143 = vadd.xlane.f32.xlu0 %v142_v3  ;;  %v1726_v41 = vld [vmem:[%s2521_s5 + $0x24] ss:$8 sps:$4 sm:$0xff]   ;;  %v1724_v42 = vld [vmem:[%s2521_s5 + $0x20] ss:$8 sps:$4 sm:$0xff]   ;;  %v1729_v43 = vld [vmem:[%s2521_s5 + $0x34] ss:$8 sps:$4 sm:$0xff]  }
  0x85   :  { %1673 = vmatpush3.bf16.msra.mxu0 %v1705_v16  ;;  %v1727_v44 = vld [vmem:[%s2521_s5 + $0x30] ss:$8 sps:$4 sm:$0xff]   ;;  %v1732_v45 = vld [vmem:[%s2521_s5 + $0x44] ss:$8 sps:$4 sm:$0xff]   ;;  %v1730_v46 = vld [vmem:[%s2521_s5 + $0x40] ss:$8 sps:$4 sm:$0xff]   ;;  %v247_v16 = vlaneseq }
  0x86   :  { %304 = vmatpush1.bf16.msra.mxu1 %v1711_v20  ;;  %554 = vmatprep.subr.bf16.mxu0 %v1720_v38  ;;  %v1735_v47 = vld [vmem:[%s2521_s5 + $0x54] ss:$8 sps:$4 sm:$0xff]   ;;  %v1733_v48 = vld [vmem:[%s2521_s5 + $0x50] ss:$8 sps:$4 sm:$0xff]   ;;  %v1738_v49 = vld [vmem:[%s2521_s5 + $0x64] ss:$8 sps:$4 sm:$0xff]  }
  0x87   :  { %305 = vmatprep.subr.bf16.mxu1 %v1712_v32  ;;  %v1736_v50 = vld [vmem:[%s2521_s5 + $0x60] ss:$8 sps:$4 sm:$0xff]   ;;  %v1741_v51 = vld [vmem:[%s2521_s5 + $0x74] ss:$8 sps:$4 sm:$0xff]   ;;  %v1739_v52 = vld [vmem:[%s2521_s5 + $0x70] ss:$8 sps:$4 sm:$0xff]  }
  0x88   :  { %v1744_v53 = vld [vmem:[%s2521_s5 + $0x84] ss:$8 sps:$4 sm:$0xff]   ;;  %v1742_v54 = vld [vmem:[%s2521_s5 + $0x80] ss:$8 sps:$4 sm:$0xff]   ;;  %v1747_v55 = vld [vmem:[%s2521_s5 + $0x94] ss:$8 sps:$4 sm:$0xff]  }
  0x89   :  { %v1745_v56 = vld [vmem:[%s2521_s5 + $0x90] ss:$8 sps:$4 sm:$0xff]   ;;  %v1750_v57 = vld [vmem:[%s2521_s5 + $0xa4] ss:$8 sps:$4 sm:$0xff]   ;;  %v1748_v58 = vld [vmem:[%s2521_s5 + $0xa0] ss:$8 sps:$4 sm:$0xff]  }
  0x8a   :  { %306 = vmatpush1.bf16.msra.mxu1 %v1714_v33  ;;  %v1753_v59 = vld [vmem:[%s2521_s5 + $0xb4] ss:$8 sps:$4 sm:$0xff]   ;;  %v1751_v60 = vld [vmem:[%s2521_s5 + $0xb0] ss:$8 sps:$4 sm:$0xff]   ;;  %v1756_v61 = vld [vmem:[%s2521_s5 + $0xc4] ss:$8 sps:$4 sm:$0xff]  }
  0x8b   :  { %307 = vmatprep.subr.bf16.mxu1 %v1715_v34  ;;  %v1754_v62 = vld [vmem:[%s2521_s5 + $0xc0] ss:$8 sps:$4 sm:$0xff]   ;;  %v1759_v63 = vld [vmem:[%s2521_s5 + $0xd4] ss:$8 sps:$4 sm:$0xff]   ;;  %vm297_vm2 = vcmask 523264   ;;  %v248_v17 = vshrl.u32 %v247_v16, 7 }
  0x8c   :  { %v1763_v14 = vld [vmem:[%s2521_s5 + $0xf0] ss:$8 sps:$4 sm:$0xff]   ;;  %v245_v19 = vld [vmem:[%s2520_s4] sm:$0x3]  ;;  %v1776_v16 = vld [vmem:[%s2523_s7 + $0x68] sm:$0xff]   ;;  %s2543_s27 = sld [smem:[#allocation21_spill]] }
  0x8d   :  { %v2357_v18 = vsub.s32 0, %v248_v17  ;;  %v2362_v20 = vsub.s32 1, %v248_v17  ;;  %v382_v38 = vld [vmem:[%s2522_s6] sm:$0x3]  ;;  %v1777_v17 = vld [vmem:[%s2523_s7 + $0x28] sm:$0xff]  }
  0x8e   :  { %308 = vmatpush1.bf16.msra.mxu1 %v1717_v35 }
 0x10d   :  { %v141_v4 = vpop.xlane.xlu0 %140 }
 0x10e   :  { %v146_v5 = vmul.f32 0.03125, %v141_v4 }
 0x110   :  { %v148_v6 = vsub.f32 %v136_v0, %v146_v5  ;;  %v1757_v0 = vld [vmem:[%s2521_s5 + $0xd0] ss:$8 sps:$4 sm:$0xff]  }
 0x111   :  { %v144_v7 = vpop.xlane.xlu0 %143 }
 0x112   :  { %v147_v8 = vmul.f32 0.03125, %v144_v7  ;;  %v150_v9 = vmul.f32 %v148_v6, %v148_v6 }
 0x114   :  { %v149_v10 = vsub.f32 %v137_v1, %v147_v8  ;;  %v152_v11 = vsel %vm138_vm0, %v150_v9, 0.0  ;;  %v1492_v1 = vld [vmem:[%s2518_s2] ss:$0 sm:$0xff] }
 0x115   :  { %153 = vadd.xlane.f32.xlu1 %v152_v11  ;;  %v1762_v11 = vld [vmem:[%s2521_s5 + $0xe4] ss:$8 sps:$4 sm:$0xff]  }
 0x116   :  { %v151_v12 = vmul.f32 %v149_v10, %v149_v10 }
 0x118   :  { %v155_v13 = vsel %vm138_vm0, %v151_v12, 0.0  ;;  %v1760_v12 = vld [vmem:[%s2521_s5 + $0xe0] ss:$8 sps:$4 sm:$0xff]  }
 0x119   :  { %156 = vadd.xlane.f32.xlu1 %v155_v13  ;;  %v1765_v13 = vld [vmem:[%s2521_s5 + $0xf4] ss:$8 sps:$4 sm:$0xff]  }
 0x1a2   :  { %v154_v21 = vpop.xlane.xlu1 %153 }
 0x1a3   :  { %v158_v22 = vmul.f32 0.03125, %v154_v21  ;;  %v250_v21 = vrot.slane %v245_v19, %v2357_v18 }
 0x1a5   :  { %v160_v23 = vadd.f32 1e-05, %v158_v22  ;;  %v254_v22 = vrot.slane %v245_v19, %v2362_v20  ;;  %v1778_v19 = vld [vmem:[%s2523_s7 + $0x70] sm:$0xff]  }
 0x1a6   :  { %v157_v24 = vpop.xlane.xlu1 %156 }
 0x1a7   :  { %v159_v25 = vmul.f32 0.03125, %v157_v24  ;;  %1862 = vrsqrt.f32 %v160_v23 }
 0x1a9   :  { %v161_v26 = vadd.f32 1e-05, %v159_v25 }
 0x1ab   :  { %1864 = vrsqrt.f32 %v161_v26 }
 0x1b1   :  { %v1863_v27 = vpop.eup %1862 }
 0x1b2   :  { %v164_v29 = vmul.f32 %v1863_v27, %v148_v6 }
 0x1b5   :  { %v1865_v28 = vpop.eup %1864 }
 0x1b6   :  { %v165_v30 = vmul.f32 %v1865_v28, %v149_v10 }
 0x1b8   :  { %v166_v31 = vpack.c.bf16 %v165_v30, %v164_v29 }
 0x1ba   :  { %1675 = vmatmul.mubr.msk.bf16.vlgmr.msra.gmra.mrb[0].mxu0 %vm138_vm0, %v166_v31 }
 0x1bb   :  { %555 = vmatpush1.bf16.msra.mxu0 %v1718_v37 }
 0x1bc   :  { %556 = vmatprep.subr.bf16.mxu0 %v1723_v39  ;;  %v387_v39 = vrot.slane %v382_v38, %v2357_v18 }
 0x1bf   :  { %557 = vmatpush1.bf16.msra.mxu0 %v1721_v40  ;;  %v391_v40 = vrot.slane %v382_v38, %v2362_v20 }
 0x1c0   :  { %558 = vmatprep.subr.bf16.mxu0 %v1726_v41 }
 0x1c3   :  { %559 = vmatpush1.bf16.msra.mxu0 %v1724_v42 }
 0x1c4   :  { %560 = vmatprep.subr.bf16.mxu0 %v1729_v43 }
 0x1c7   :  { %561 = vmatpush1.bf16.msra.mxu0 %v1727_v44 }
 0x1c8   :  { %562 = vmatprep.subr.bf16.mxu0 %v1732_v45 }
 0x1cb   :  { %563 = vmatpush1.bf16.msra.mxu0 %v1730_v46 }
 0x1cc   :  { %564 = vmatprep.subr.bf16.mxu0 %v1735_v47 }
 0x1cf   :  { %565 = vmatpush1.bf16.msra.mxu0 %v1733_v48 }
 0x1d0   :  { %566 = vmatprep.subr.bf16.mxu0 %v1738_v49 }
 0x1d3   :  { %567 = vmatpush1.bf16.msra.mxu0 %v1736_v50 }
 0x1d4   :  { %568 = vmatprep.subr.bf16.mxu0 %v1741_v51 }
 0x1d7   :  { %569 = vmatpush1.bf16.msra.mxu0 %v1739_v52 }
 0x1d8   :  { %570 = vmatprep.subr.bf16.mxu0 %v1744_v53 }
 0x1db   :  { %571 = vmatpush1.bf16.msra.mxu0 %v1742_v54 }
 0x1dc   :  { %572 = vmatprep.subr.bf16.mxu0 %v1747_v55  ;;  %v1766_v55 = vld [vmem:[%s2523_s7 + $0x40] sm:$0xff]  }
 0x1dd   :  { %1621 = vmatprep.subr.bf16.mxu1 %v1766_v55 }
 0x1df   :  { %573 = vmatpush1.bf16.msra.mxu0 %v1745_v56  ;;  %v1767_v56 = vld [vmem:[%s2523_s7] sm:$0xff]  }
 0x1e0   :  { %574 = vmatprep.subr.bf16.mxu0 %v1750_v57  ;;  %v1768_v57 = vld [vmem:[%s2523_s7 + $0x48] sm:$0xff]  }
 0x1e3   :  { %575 = vmatpush1.bf16.msra.mxu0 %v1748_v58  ;;  %v1769_v58 = vld [vmem:[%s2523_s7 + $0x8] sm:$0xff]  }
 0x1e4   :  { %576 = vmatprep.subr.bf16.mxu0 %v1753_v59  ;;  %v1770_v59 = vld [vmem:[%s2523_s7 + $0x50] sm:$0xff]  }
 0x1e7   :  { %577 = vmatpush1.bf16.msra.mxu0 %v1751_v60  ;;  %v1771_v60 = vld [vmem:[%s2523_s7 + $0x10] sm:$0xff]  }
 0x1e8   :  { %578 = vmatprep.subr.bf16.mxu0 %v1756_v61 }
 0x1eb   :  { %579 = vmatpush1.bf16.msra.mxu0 %v1754_v62 }
 0x1ec   :  { %580 = vmatprep.subr.bf16.mxu0 %v1759_v63 }
 0x1ef   :  { %581 = vmatpush1.bf16.msra.mxu0 %v1757_v0 }
 0x1f0   :  { %582 = vmatprep.subr.bf16.mxu0 %v1762_v11  ;;  %v1772_v11 = vld [vmem:[%s2523_s7 + $0x58] sm:$0xff]  }
 0x1f3   :  { %583 = vmatpush1.bf16.msra.mxu0 %v1760_v12  ;;  %v1773_v12 = vld [vmem:[%s2523_s7 + $0x18] sm:$0xff]  }
 0x1f4   :  { %584 = vmatprep.subr.bf16.mxu0 %v1765_v13  ;;  %v1774_v13 = vld [vmem:[%s2523_s7 + $0x60] sm:$0xff]  }
 0x1f7   :  { %585 = vmatpush1.bf16.msra.mxu0 %v1763_v14  ;;  %v1775_v14 = vld [vmem:[%s2523_s7 + $0x20] sm:$0xff]  }
 0x28d   :  { %v227_v2 = vpop.f32.mrb[0].mxu0 }
 0x28e   :  { %v228_v3 = vadd.f32 %v1492_v1, %v227_v2  ;;  %v1676_v4 = vpop.f32.mrb[1].mxu0 }
 0x28f   :  { %v230_v5 = vpop.f32.mrb[2].mxu0 }
 0x290   :  { %v231_v6 = vadd.f32 %v1492_v1, %v230_v5  ;;  %v1677_v7 = vpop.f32.mrb[3].mxu0  ;;  %v234_v8 = vmax.f32 %v228_v3, 0.0 }
 0x292   :  { %v235_v9 = vmax.f32 %v231_v6, 0.0 }
 0x294   :  { %v236_v10 = vpack.c.bf16 %v235_v9, %v234_v8 }
 0x296   :  { %1504 = vmatmul.mubr.msk.bf16.vlgmr.msra.gmra.mrb[0].mxu1 %vm297_vm2, %v236_v10 }
 0x297   :  { %1622 = vmatpush3.bf16.msra.mxu1 %v1767_v56  ;;  %v1794_v56 = vld [vmem:[#allocation11] ss:$8 sps:$4 sm:$0xff]  }
 0x298   :  { %1623 = vmatprep.subr.bf16.mxu1 %v1768_v57 }
 0x29b   :  { %1624 = vmatpush3.bf16.msra.mxu1 %v1769_v58  ;;  %v1799_v58 = vld [vmem:[#allocation11 + $0x14] ss:$8 sps:$4 sm:$0xff]  }
 0x29c   :  { %1625 = vmatprep.subr.bf16.mxu1 %v1770_v59  ;;  %v1797_v59 = vld [vmem:[#allocation11 + $0x10] ss:$8 sps:$4 sm:$0xff]  }
 0x29f   :  { %1626 = vmatpush3.bf16.msra.mxu1 %v1771_v60  ;;  %v1802_v60 = vld [vmem:[#allocation11 + $0x24] ss:$8 sps:$4 sm:$0xff]  }
 0x2a0   :  { %1627 = vmatprep.subr.bf16.mxu1 %v1772_v11  ;;  %v1821_v11 = vld [vmem:[#allocation11 + $0x90] ss:$8 sps:$4 sm:$0xff]  }
 0x2a3   :  { %1628 = vmatpush3.bf16.msra.mxu1 %v1773_v12  ;;  %v1826_v12 = vld [vmem:[#allocation11 + $0xa4] ss:$8 sps:$4 sm:$0xff]  }
 0x2a4   :  { %1629 = vmatprep.subr.bf16.mxu1 %v1774_v13  ;;  %v1824_v13 = vld [vmem:[#allocation11 + $0xa0] ss:$8 sps:$4 sm:$0xff]  }
 0x2a7   :  { %1630 = vmatpush3.bf16.msra.mxu1 %v1775_v14  ;;  %v1829_v14 = vld [vmem:[#allocation11 + $0xb4] ss:$8 sps:$4 sm:$0xff]  }
 0x2a8   :  { %1631 = vmatprep.subr.bf16.mxu1 %v1776_v16  ;;  %v1827_v16 = vld [vmem:[#allocation11 + $0xb0] ss:$8 sps:$4 sm:$0xff]  }
 0x2ab   :  { %1632 = vmatpush3.bf16.msra.mxu1 %v1777_v17  ;;  %v1832_v17 = vld [vmem:[#allocation11 + $0xc4] ss:$8 sps:$4 sm:$0xff]  }
 0x2ac   :  { %1633 = vmatprep.subr.bf16.mxu1 %v1778_v19  ;;  %v1830_v19 = vld [vmem:[#allocation11 + $0xc0] ss:$8 sps:$4 sm:$0xff]  }
 0x369   :  { %v335_v23 = vpop.f32.mrb[0].mxu1 }
 0x36a   :  { %v336_v24 = vadd.f32 %v335_v23, %v250_v21  ;;  %v337_v25 = vpop.f32.mrb[1].mxu1  ;;  %v1781_v23 = vld [vmem:[%s2523_s7 + $0x38] sm:$0xff]  }
 0x36b   :  { %v338_v26 = vadd.f32 %v337_v25, %v254_v22  ;;  %v339_v27 = vpop.f32.mrb[2].mxu1 }
 0x36c   :  { %v340_v28 = vadd.f32 %v339_v27, %v250_v21  ;;  %v341_v29 = vpop.f32.mrb[3].mxu1  ;;  %v344_v31 = vmax.f32 %v336_v24, 0.0  ;;  %v1779_v21 = vld [vmem:[%s2523_s7 + $0x30] sm:$0xff]  }
 0x36d   :  { %v342_v30 = vadd.f32 %v341_v29, %v254_v22  ;;  %v345_v33 = vmax.f32 %v338_v26, 0.0  ;;  %v1780_v22 = vld [vmem:[%s2523_s7 + $0x78] sm:$0xff]   ;;  %1634 = vmatpush3.bf16.msra.mxu1 %v1779_v21  ;;  %v1784_v24 = vld [vmem:[#allocation8 + $0x4] ss:$8 sps:$4 sm:$0xff]  }
 0x36e   :  { %v346_v32 = vmax.f32 %v340_v28, 0.0  ;;  %1635 = vmatprep.subr.bf16.mxu1 %v1780_v22  ;;  %v1835_v21 = vld [vmem:[#allocation11 + $0xd4] ss:$8 sps:$4 sm:$0xff]   ;;  %v1833_v22 = vld [vmem:[#allocation11 + $0xd0] ss:$8 sps:$4 sm:$0xff]  }
 0x36f   :  { %v347_v34 = vmax.f32 %v342_v30, 0.0 }
 0x370   :  { %v348_v35 = vpack.c.bf16 %v346_v32, %v344_v31 }
 0x371   :  { %v349_v37 = vpack.c.bf16 %v347_v34, %v345_v33  ;;  %1636 = vmatpush3.bf16.msra.mxu1 %v1781_v23  ;;  %v1838_v23 = vld [vmem:[#allocation11 + $0xe4] ss:$8 sps:$4 sm:$0xff]  }
 0x372   :  { %876 = vmatprep.subr.bf16.mxu1 %v1784_v24  ;;  %v1836_v24 = vld [vmem:[#allocation11 + $0xe0] ss:$8 sps:$4 sm:$0xff]  }
 0x373   :  { %586 = vmatprep.mubr.bf16.mxu0 %v349_v37 }
 0x374   :  { %587 = vmatmul.mubr.bf16.vlgmr.msra.gmra.mrb[4].mxu0 %v348_v35 }
 0x447   :  { %v588_v41 = vpop.f32.mrb[4].mxu0 }
 0x448   :  { %v589_v42 = vadd.f32 %v588_v41, %v387_v39  ;;  %v590_v43 = vpop.f32.mrb[5].mxu0  ;;  %v1787_v41 = vld [vmem:[#allocation8 + $0x14] ss:$8 sps:$4 sm:$0xff]  }
 0x449   :  { %v591_v44 = vadd.f32 %v590_v43, %v391_v40  ;;  %v592_v45 = vpop.f32.mrb[6].mxu0  ;;  %v1790_v43 = vld [vmem:[#allocation8 + $0x24] ss:$8 sps:$4 sm:$0xff]  }
 0x44a   :  { %v597_v46 = vmax.f32 %v589_v42, 0.0  ;;  %v593_v47 = vadd.f32 %v592_v45, %v387_v39  ;;  %v594_v48 = vpop.f32.mrb[7].mxu0  ;;  %v1785_v42 = vld [vmem:[#allocation8 + $0x10] ss:$8 sps:$4 sm:$0xff]   ;;  %v1793_v45 = vld [vmem:[#allocation8 + $0x34] ss:$8 sps:$4 sm:$0xff]  }
 0x44b   :  { %v598_v49 = vmax.f32 %v591_v44, 0.0  ;;  %v595_v50 = vadd.f32 %v594_v48, %v391_v40  ;;  %v1782_v40 = vld [vmem:[#allocation8] ss:$8 sps:$4 sm:$0xff]  }
 0x44c   :  { %v599_v51 = vmax.f32 %v593_v47, 0.0  ;;  %v1788_v44 = vld [vmem:[#allocation8 + $0x20] ss:$8 sps:$4 sm:$0xff]  }
 0x44d   :  { %v600_v52 = vmax.f32 %v595_v50, 0.0  ;;  %v601_v53 = vadd.f32 %v598_v49, %v597_v46  ;;  %v1796_v47 = vld [vmem:[#allocation11 + $0x4] ss:$8 sps:$4 sm:$0xff]  }
 0x44f   :  { %602 = vadd.xlane.f32.xlu0 %v601_v53  ;;  %v604_v54 = vadd.f32 %v600_v52, %v599_v51 }
 0x451   :  { %605 = vadd.xlane.f32.xlu1 %v604_v54 }
 0x4dc   :  { %v603_v61 = vpop.xlane.xlu0 %602 }
 0x4dd   :  { %v608_v62 = vmul.f32 0.00390625, %v603_v61  ;;  %v1800_v61 = vld [vmem:[#allocation11 + $0x20] ss:$8 sps:$4 sm:$0xff]  }
 0x4de   :  { %v606_v63 = vpop.xlane.xlu1 %605 }
 0x4df   :  { %v610_v0 = vsub.f32 %v597_v46, %v608_v62  ;;  %v611_v1 = vsub.f32 %v598_v49, %v608_v62  ;;  %v609_v2 = vmul.f32 0.00390625, %v606_v63  ;;  %v1791_v46 = vld [vmem:[#allocation8 + $0x30] ss:$8 sps:$4 sm:$0xff]  }
 0x4e0   :  { %v1805_v62 = vld [vmem:[#allocation11 + $0x34] ss:$8 sps:$4 sm:$0xff]   ;;  %v1803_v63 = vld [vmem:[#allocation11 + $0x30] ss:$8 sps:$4 sm:$0xff]  }
 0x4e1   :  { %v612_v3 = vsub.f32 %v599_v51, %v609_v2  ;;  %v613_v4 = vsub.f32 %v600_v52, %v609_v2  ;;  %v614_v5 = vmul.f32 %v610_v0, %v610_v0  ;;  %v615_v6 = vmul.f32 %v611_v1, %v611_v1  ;;  %v1537_v52 = vld [vmem:[#allocation7] ss:$0 sm:$0xff] }
 0x4e2   :  { %v1811_v2 = vld [vmem:[#allocation11 + $0x54] ss:$8 sps:$4 sm:$0xff]  }
 0x4e3   :  { %v618_v7 = vadd.f32 %v615_v6, %v614_v5  ;;  %v616_v8 = vmul.f32 %v612_v3, %v612_v3  ;;  %v617_v9 = vmul.f32 %v613_v4, %v613_v4  ;;  %v1812_v5 = vld [vmem:[#allocation11 + $0x60] ss:$8 sps:$4 sm:$0xff]   ;;  %v1817_v6 = vld [vmem:[#allocation11 + $0x74] ss:$8 sps:$4 sm:$0xff]  }
 0x4e5   :  { %619 = vadd.xlane.f32.xlu0 %v618_v7  ;;  %v621_v10 = vadd.f32 %v617_v9, %v616_v8  ;;  %v1815_v7 = vld [vmem:[#allocation11 + $0x70] ss:$8 sps:$4 sm:$0xff]   ;;  %v1820_v8 = vld [vmem:[#allocation11 + $0x84] ss:$8 sps:$4 sm:$0xff]   ;;  %v1818_v9 = vld [vmem:[#allocation11 + $0x80] ss:$8 sps:$4 sm:$0xff]  }
 0x4e7   :  { %622 = vadd.xlane.f32.xlu1 %v621_v10  ;;  %v1823_v10 = vld [vmem:[#allocation11 + $0x94] ss:$8 sps:$4 sm:$0xff]  }
 0x572   :  { %v620_v25 = vpop.xlane.xlu0 %619 }
 0x573   :  { %v624_v26 = vmul.f32 0.00390625, %v620_v25  ;;  %v1841_v25 = vld [vmem:[#allocation11 + $0xf4] ss:$8 sps:$4 sm:$0xff]  }
 0x574   :  { %v623_v27 = vpop.xlane.xlu1 %622 }
 0x575   :  { %v626_v28 = vadd.f32 1e-05, %v624_v26  ;;  %v625_v29 = vmul.f32 0.00390625, %v623_v27  ;;  %v1839_v26 = vld [vmem:[#allocation11 + $0xf0] ss:$8 sps:$4 sm:$0xff]  }
 0x576   :  { %v821_v27 = vld [vmem:[#allocation10] sm:$0x3] }
 0x577   :  { %1866 = vrsqrt.f32 %v626_v28  ;;  %v627_v30 = vadd.f32 1e-05, %v625_v29  ;;  %v826_v28 = vrot.slane %v821_v27, %v2357_v18  ;;  %v830_v29 = vrot.slane %v821_v27, %v2362_v20  ;;  %v1857_v27 = vld [vmem:[%s2529_s13 + $0x38] sm:$0xff]  }
 0x579   :  { %1868 = vrsqrt.f32 %v627_v30 }
 0x581   :  { %v1867_v31 = vpop.eup %1866 }
 0x582   :  { %v631_v33 = vmul.f32 %v1867_v31, %v611_v1  ;;  %v630_v35 = vmul.f32 %v1867_v31, %v610_v0  ;;  %v1808_v0 = vld [vmem:[#allocation11 + $0x44] ss:$8 sps:$4 sm:$0xff]   ;;  %v1806_v1 = vld [vmem:[#allocation11 + $0x40] ss:$8 sps:$4 sm:$0xff]  }
 0x583   :  { %v1869_v32 = vpop.eup %1868 }
 0x584   :  { %v633_v34 = vmul.f32 %v1869_v32, %v613_v4  ;;  %v632_v37 = vmul.f32 %v1869_v32, %v612_v3  ;;  %v1809_v3 = vld [vmem:[#allocation11 + $0x50] ss:$8 sps:$4 sm:$0xff]   ;;  %v1814_v4 = vld [vmem:[#allocation11 + $0x64] ss:$8 sps:$4 sm:$0xff]  }
 0x586   :  { %v635_v38 = vpack.c.bf16 %v633_v34, %v631_v33  ;;  %v634_v39 = vpack.c.bf16 %v632_v37, %v630_v35 }
 0x588   :  { %803 = vmatprep.mubr.bf16.mxu1 %v635_v38 }
 0x589   :  { %804 = vmatmul.mubr.bf16.vlgmr.msra.gmra.mrb[4].mxu1 %v634_v39 }
 0x58a   :  { %877 = vmatpush1.bf16.msra.mxu1 %v1782_v40  ;;  %908 = vmatprep.mubr.bf16.mxu1 %v2050_v36 }
 0x58b   :  { %878 = vmatprep.subr.bf16.mxu1 %v1787_v41 }
 0x58e   :  { %879 = vmatpush1.bf16.msra.mxu1 %v1785_v42 }
 0x58f   :  { %880 = vmatprep.subr.bf16.mxu1 %v1790_v43 }
 0x592   :  { %881 = vmatpush1.bf16.msra.mxu1 %v1788_v44 }
 0x593   :  { %882 = vmatprep.subr.bf16.mxu1 %v1793_v45  ;;  %v957_v45 = vld [vmem:[%s2528_s12] sm:$0x3] }
 0x596   :  { %883 = vmatpush1.bf16.msra.mxu1 %v1791_v46  ;;  %v962_v46 = vrot.slane %v957_v45, %v2357_v18  ;;  %v1842_v18 = vld [vmem:[%s2529_s13 + $0x40] sm:$0xff]  }
 0x597   :  { %1129 = vmatprep.subr.bf16.mxu1 %v1796_v47  ;;  %v966_v47 = vrot.slane %v957_v45, %v2362_v20  ;;  %v1843_v20 = vld [vmem:[%s2529_s13] sm:$0xff]   ;;  %1643 = vmatprep.subr.bf16.mxu0 %v1842_v18  ;;  %v1860_v45 = vld [vmem:[%s2531_s15 + $0x10] sm:$0xff]  }
 0x598   :  { %1644 = vmatpush3.bf16.msra.mxu0 %v1843_v20 }
 0x65c   :  { %v1637_v48 = vpop.f32.mrb[4].mxu1 }
 0x65d   :  { %v1638_v49 = vpop.f32.mrb[5].mxu1 }
 0x65e   :  { %v1639_v50 = vadd.f32 %v1638_v49, %v1637_v48  ;;  %v1640_v51 = vpop.f32.mrb[6].mxu1 }
 0x65f   :  { %v1641_v53 = vpop.f32.mrb[7].mxu1 }
 0x660   :  { %v1642_v54 = vadd.f32 %v1641_v53, %v1640_v51  ;;  %v806_v36 = vadd.f32 %v1639_v50, %v1537_v52 }
 0x662   :  { %v809_v55 = vadd.f32 %v1642_v54, %v1537_v52 }
 0x664   :  { %v812_v57 = vpack.c.bf16 %v809_v55, %v806_v36 }
 0x666   :  { %1562 = vmatmul.mubr.msk.bf16.vlgmr.msra.gmra.mrb[8].mxu1 %vm297_vm2, %v812_v57 }
 0x667   :  { %1130 = vmatpush1.bf16.msra.mxu1 %v1794_v56 }
 0x668   :  { %1131 = vmatprep.subr.bf16.mxu1 %v1799_v58 }
 0x66b   :  { %1132 = vmatpush1.bf16.msra.mxu1 %v1797_v59 }
 0x66c   :  { %1133 = vmatprep.subr.bf16.mxu1 %v1802_v60 }
 0x66f   :  { %1134 = vmatpush1.bf16.msra.mxu1 %v1800_v61  ;;  %v1844_v61 = vld [vmem:[%s2529_s13 + $0x48] sm:$0xff]  }
 0x670   :  { %1135 = vmatprep.subr.bf16.mxu1 %v1805_v62  ;;  %v1845_v62 = vld [vmem:[%s2529_s13 + $0x8] sm:$0xff]   ;;  %1645 = vmatprep.subr.bf16.mxu0 %v1844_v61 }
 0x671   :  { %1646 = vmatpush3.bf16.msra.mxu0 %v1845_v62 }
 0x673   :  { %1136 = vmatpush1.bf16.msra.mxu1 %v1803_v63  ;;  %v1846_v63 = vld [vmem:[%s2529_s13 + $0x50] sm:$0xff]  }
 0x674   :  { %1137 = vmatprep.subr.bf16.mxu1 %v1808_v0  ;;  %v1847_v0 = vld [vmem:[%s2529_s13 + $0x10] sm:$0xff]   ;;  %1647 = vmatprep.subr.bf16.mxu0 %v1846_v63 }
 0x675   :  { %1648 = vmatpush3.bf16.msra.mxu0 %v1847_v0 }
 0x677   :  { %1138 = vmatpush1.bf16.msra.mxu1 %v1806_v1 }
 0x678   :  { %1139 = vmatprep.subr.bf16.mxu1 %v1811_v2 }
 0x67b   :  { %1140 = vmatpush1.bf16.msra.mxu1 %v1809_v3 }
 0x67c   :  { %1141 = vmatprep.subr.bf16.mxu1 %v1814_v4 }
 0x67f   :  { %1142 = vmatpush1.bf16.msra.mxu1 %v1812_v5 }
 0x680   :  { %1143 = vmatprep.subr.bf16.mxu1 %v1817_v6 }
 0x683   :  { %1144 = vmatpush1.bf16.msra.mxu1 %v1815_v7 }
 0x684   :  { %1145 = vmatprep.subr.bf16.mxu1 %v1820_v8 }
 0x687   :  { %1146 = vmatpush1.bf16.msra.mxu1 %v1818_v9 }
 0x688   :  { %1147 = vmatprep.subr.bf16.mxu1 %v1823_v10 }
 0x68b   :  { %1148 = vmatpush1.bf16.msra.mxu1 %v1821_v11 }
 0x68c   :  { %1149 = vmatprep.subr.bf16.mxu1 %v1826_v12 }
 0x68f   :  { %1150 = vmatpush1.bf16.msra.mxu1 %v1824_v13 }
 0x690   :  { %1151 = vmatprep.subr.bf16.mxu1 %v1829_v14 }
 0x693   :  { %1152 = vmatpush1.bf16.msra.mxu1 %v1827_v16  ;;  %v1848_v16 = vld [vmem:[%s2529_s13 + $0x58] sm:$0xff]  }
 0x694   :  { %1153 = vmatprep.subr.bf16.mxu1 %v1832_v17  ;;  %v1849_v17 = vld [vmem:[%s2529_s13 + $0x18] sm:$0xff]   ;;  %1649 = vmatprep.subr.bf16.mxu0 %v1848_v16 }
 0x695   :  { %1650 = vmatpush3.bf16.msra.mxu0 %v1849_v17 }
 0x697   :  { %1154 = vmatpush1.bf16.msra.mxu1 %v1830_v19  ;;  %v1850_v19 = vld [vmem:[%s2529_s13 + $0x60] sm:$0xff]  }
 0x698   :  { %1155 = vmatprep.subr.bf16.mxu1 %v1835_v21  ;;  %v1851_v21 = vld [vmem:[%s2529_s13 + $0x20] sm:$0xff]   ;;  %1651 = vmatprep.subr.bf16.mxu0 %v1850_v19 }
 0x699   :  { %1652 = vmatpush3.bf16.msra.mxu0 %v1851_v21 }
 0x69b   :  { %1156 = vmatpush1.bf16.msra.mxu1 %v1833_v22  ;;  %v1852_v22 = vld [vmem:[%s2529_s13 + $0x68] sm:$0xff]  }
 0x69c   :  { %1157 = vmatprep.subr.bf16.mxu1 %v1838_v23  ;;  %v1853_v23 = vld [vmem:[%s2529_s13 + $0x28] sm:$0xff]   ;;  %1653 = vmatprep.subr.bf16.mxu0 %v1852_v22 }
 0x69d   :  { %1654 = vmatpush3.bf16.msra.mxu0 %v1853_v23 }
 0x69f   :  { %1158 = vmatpush1.bf16.msra.mxu1 %v1836_v24  ;;  %v1854_v24 = vld [vmem:[%s2529_s13 + $0x70] sm:$0xff]  }
 0x6a0   :  { %1159 = vmatprep.subr.bf16.mxu1 %v1841_v25  ;;  %v1855_v25 = vld [vmem:[%s2529_s13 + $0x30] sm:$0xff]   ;;  %1655 = vmatprep.subr.bf16.mxu0 %v1854_v24 }
 0x6a1   :  { %1656 = vmatpush3.bf16.msra.mxu0 %v1855_v25 }
 0x6a3   :  { %1160 = vmatpush1.bf16.msra.mxu1 %v1839_v26  ;;  %v1856_v26 = vld [vmem:[%s2529_s13 + $0x78] sm:$0xff]  }
 0x6a4   :  { %1657 = vmatprep.subr.bf16.mxu0 %v1856_v26 }
 0x6a5   :  { %1658 = vmatpush3.bf16.msra.mxu0 %v1857_v27 }
 0x6a6   :  { %1678 = vmatprep.subr.bf16.mxu0 %v2048_v15 }
 0x739   :  { %v910_v30 = vpop.f32.mrb[8].mxu1 }
 0x73a   :  { %v911_v31 = vadd.f32 %v910_v30, %v826_v28  ;;  %v912_v32 = vpop.f32.mrb[9].mxu1 }
 0x73b   :  { %v913_v33 = vadd.f32 %v912_v32, %v830_v29  ;;  %v914_v34 = vpop.f32.mrb[10].mxu1 }
 0x73c   :  { %v915_v35 = vadd.f32 %v914_v34, %v826_v28  ;;  %v916_v37 = vpop.f32.mrb[11].mxu1  ;;  %v919_v39 = vmax.f32 %v911_v31, 0.0 }
 0x73d   :  { %v917_v38 = vadd.f32 %v916_v37, %v830_v29  ;;  %v920_v41 = vmax.f32 %v913_v33, 0.0 }
 0x73e   :  { %v921_v40 = vmax.f32 %v915_v35, 0.0 }
 0x73f   :  { %v922_v42 = vmax.f32 %v917_v38, 0.0 }
 0x740   :  { %v923_v43 = vpack.c.bf16 %v921_v40, %v919_v39 }
 0x741   :  { %v924_v44 = vpack.c.bf16 %v922_v42, %v920_v41 }
 0x743   :  { %1161 = vmatprep.mubr.bf16.mxu1 %v924_v44  ;;  %v1859_v44 = vld [vmem:[%s2531_s15 + $0x8] sm:$0xff]  }
 0x744   :  { %1162 = vmatmul.mubr.bf16.vlgmr.msra.gmra.mrb[12].mxu1 %v923_v43  ;;  %v1858_v43 = vld [vmem:[%s2531_s15] sm:$0xff]  }
 0x817   :  { %v1163_v48 = vpop.f32.mrb[12].mxu1 }
 0x818   :  { %v1164_v49 = vadd.f32 %v1163_v48, %v962_v46  ;;  %v1165_v50 = vpop.f32.mrb[13].mxu1 }
 0x819   :  { %v1166_v51 = vadd.f32 %v1165_v50, %v966_v47  ;;  %v1167_v52 = vpop.f32.mrb[14].mxu1 }
 0x81a   :  { %v1172_v53 = vmax.f32 %v1164_v49, 0.0  ;;  %v1168_v54 = vadd.f32 %v1167_v52, %v962_v46  ;;  %v1169_v36 = vpop.f32.mrb[15].mxu1  ;;  %v1861_v46 = vld [vmem:[%s2531_s15 + $0x18] sm:$0xff]   ;;  %s2051_s15 = smov [#allocation13]  }
 0x81b   :  { %v1173_v55 = vmax.f32 %v1166_v51, 0.0  ;;  %v1170_v56 = vadd.f32 %v1169_v36, %v966_v47  ;;  %v1595_v51 = vld [vmem:[%s2530_s14] ss:$0 sm:$0xff]  ;;  %s1477_s0 = sshll.u32 %s2051_s15, 4  ;;  %s1478_s0 = int_to_ptr.vmem [resolvable:$true] %s1477_s0 }
 0x81c   :  { %v1174_v57 = vmax.f32 %v1168_v54, 0.0  ;;  %s2006_s14 = scalar_lea.vmem %s1478_s0, 256  ;;  %p2011_p7 = scmp.lt.s32.totalorder %s1478_s0, %s1478_s0 }
 0x81d   :  { %v1175_v58 = vmax.f32 %v1170_v56, 0.0  ;;  %v1176_v59 = vadd.f32 %v1173_v55, %v1172_v53  ;;  %p2007_p6 = scmp.ne.s32.totalorder %s1478_s0, %s2006_s14  ;;  %p2012_p8 = scmp.lt.s32.totalorder %s2006_s14, %s2006_s14 }
 0x81f   :  { %1177 = vadd.xlane.f32.xlu0 %v1176_v59  ;;  %v1179_v60 = vadd.f32 %v1175_v58, %v1174_v57  ;;  %p2013_p9 = por %p2012_p8, %p2011_p7 }
 0x821   :  { %1180 = vadd.xlane.f32.xlu1 %v1179_v60  ;;  %p2014_p10 = pnand %p2013_p9, %p2007_p6 }
 0x8ac   :  { %v1178_v1 = vpop.xlane.xlu0 %1177 }
 0x8ad   :  { %v1182_v2 = vmul.f32 0.00390625, %v1178_v1 }
 0x8ae   :  { %v1181_v3 = vpop.xlane.xlu1 %1180 }
 0x8af   :  { %v1184_v4 = vsub.f32 %v1172_v53, %v1182_v2  ;;  %v1185_v5 = vsub.f32 %v1173_v55, %v1182_v2  ;;  %v1183_v6 = vmul.f32 0.00390625, %v1181_v3 }
 0x8b1   :  { %v1186_v7 = vsub.f32 %v1174_v57, %v1183_v6  ;;  %v1187_v8 = vsub.f32 %v1175_v58, %v1183_v6  ;;  %v1188_v9 = vmul.f32 %v1184_v4, %v1184_v4  ;;  %v1189_v10 = vmul.f32 %v1185_v5, %v1185_v5 }
 0x8b3   :  { %v1192_v11 = vadd.f32 %v1189_v10, %v1188_v9  ;;  %v1190_v12 = vmul.f32 %v1186_v7, %v1186_v7  ;;  %v1191_v13 = vmul.f32 %v1187_v8, %v1187_v8 }
 0x8b5   :  { %1193 = vadd.xlane.f32.xlu0 %v1192_v11  ;;  %v1195_v14 = vadd.f32 %v1191_v13, %v1190_v12 }
 0x8b7   :  { %1196 = vadd.xlane.f32.xlu1 %v1195_v14 }
 0x942   :  { %v1194_v28 = vpop.xlane.xlu0 %1193 }
 0x943   :  { %v1198_v29 = vmul.f32 0.00390625, %v1194_v28 }
 0x944   :  { %v1197_v30 = vpop.xlane.xlu1 %1196 }
 0x945   :  { %v1200_v31 = vadd.f32 1e-05, %v1198_v29  ;;  %v1199_v32 = vmul.f32 0.00390625, %v1197_v30 }
 0x947   :  { %1870 = vrsqrt.f32 %v1200_v31  ;;  %v1201_v33 = vadd.f32 1e-05, %v1199_v32 }
 0x949   :  { %1872 = vrsqrt.f32 %v1201_v33 }
 0x951   :  { %v1871_v34 = vpop.eup %1870 }
 0x952   :  { %v1205_v37 = vmul.f32 %v1871_v34, %v1185_v5  ;;  %v1204_v39 = vmul.f32 %v1871_v34, %v1184_v4 }
 0x953   :  { %v1873_v35 = vpop.eup %1872 }
 0x954   :  { %v1207_v38 = vmul.f32 %v1873_v35, %v1187_v8  ;;  %v1206_v40 = vmul.f32 %v1873_v35, %v1186_v7 }
 0x956   :  { %v1209_v41 = vpack.c.bf16 %v1207_v38, %v1205_v37  ;;  %v1208_v42 = vpack.c.bf16 %v1206_v40, %v1204_v39 }
 0x958   :  { %1377 = vmatprep.mubr.bf16.mxu0 %v1209_v41 }
 0x959   :  { %1378 = vmatmul.mubr.bf16.vlgmr.msra.gmra.mrb[8].mxu0 %v1208_v42 }
 0x95a   :  { %1679 = vmatpush3.bf16.msra.mxu0 %v1858_v43  ;;  %1686 = vmatprep.mubr.msk.bf16.mxu0 %vm2049_vm1, %v2048_v15 }
 0x95b   :  { %1680 = vmatprep.subr.bf16.mxu0 %v2048_v15 }
 0x95e   :  { %1681 = vmatpush3.bf16.msra.mxu0 %v1859_v44 }
 0x95f   :  { %1682 = vmatprep.subr.bf16.mxu0 %v2048_v15 }
 0x962   :  { %1683 = vmatpush3.bf16.msra.mxu0 %v1860_v45 }
 0x963   :  { %1684 = vmatprep.subr.bf16.mxu0 %v2048_v15  ;;  %v1612_v15 = vld [vmem:[%s2543_s27] ss:$0 sm:$0xff] }
 0x966   :  { %1685 = vmatpush3.bf16.msra.mxu0 %v1861_v46 }
 0xa2c   :  { %v1659_v47 = vpop.f32.mrb[8].mxu0 }
 0xa2d   :  { %v1660_v48 = vpop.f32.mrb[9].mxu0 }
 0xa2e   :  { %v1661_v49 = vadd.f32 %v1660_v48, %v1659_v47  ;;  %v1662_v50 = vpop.f32.mrb[10].mxu0 }
 0xa2f   :  { %v1663_v52 = vpop.f32.mrb[11].mxu0 }
 0xa30   :  { %v1664_v53 = vadd.f32 %v1663_v52, %v1662_v50  ;;  %v1380_v54 = vadd.f32 %v1661_v49, %v1595_v51 }
 0xa32   :  { %v1383_v36 = vadd.f32 %v1664_v53, %v1595_v51 }
 0xa34   :  { %v1386_v55 = vpack.c.bf16 %v1383_v36, %v1380_v54 }
 0xa36   :  { %1687 = vmatmul.mubr.msk.bf16.vlgmr.msra.gmra.mrb[12].mxu0 %vm297_vm2, %v1386_v55 }
 0xb09   :  { %v1463_v56 = vpop.f32.mrb[12].mxu0 }
 0xb0a   :  { %v1464_v57 = vadd.f32 %v1612_v15, %v1463_v56  ;;  %v1688_v58 = vpop.f32.mrb[13].mxu0 }
 0xb0b   :  { %v1466_v59 = vpop.f32.mrb[14].mxu0 }
 0xb0c   :  { %1470 = vst [vmem:[#allocation13] sm:$0xff] %v1464_v57  ;;  %v1467_v60 = vadd.f32 %v1612_v15, %v1466_v59  ;;  %v1689_v18 = vpop.f32.mrb[15].mxu0 }
 0xb0e   :  { %1471 = vst [vmem:[#allocation13 + $0x8] sm:$0xff] %v1467_v60 }
 0xb0f   :  { %2017 = shalt.err (!%p2014_p10)
}
 0xb10   :  { %s2544_s30 = sld [smem:[#allocation22_spill]] }
 0xb16   :  { %s2018_s18 = scalar_lea.hbm %s2544_s30, 256 }
 0xb17   :  { %p2019_p11 = scmp.ne.s32.totalorder %s2544_s30, %s2018_s18  ;;  %p2022_p12 = scmp.lt.u32.totalorder %s2018_s18, %s2544_s30 }
 0xb19   :  { %p2024_p13 = pnand %p2022_p12, %p2019_p11 }
 0xb1b   :  { %2027 = shalt.err (!%p2024_p13)
}
 0xb1c   :  { %1483 = dma.vmem_to_hbm [thread:$0]  %s1478_s0, 256, %s2544_s30, [#allocation4], %s2043_s28, %s2043_s28, %s2044_s20  }
 0xb1d   :  { %2036 = dma.done.wait [#allocation4], 256  }
 0xb1e   :  { %2037 = vsyncadd [#allocation4], 4294967040 }
 0xb1f   :  { %1487 = vsyncpa [#allocation3], 1 }
 0xb20   :  { %1488 = vsyncpa [#allocation6], 1 }
 0xb21   :  { %1489 = vsyncpa [#allocation9], 1 }
 0xb22   :  { %1490 = vsyncpa [#allocation12], 1 }
 0xb23   :  { %1491 = vsyncpa [#allocation4], 1 }

</bundles_post_ra>
